<compile_context>
chip_gen: v5e
topology: v5e:2x2
jax: 0.10.0
libtpu: 0.0.40
codegen_flags: <defaults>
</compile_context>

<pallas_src>
import functools

import jax
import jax.numpy as jnp
from jax.experimental import pallas as pl
from jax.experimental.pallas import tpu as pltpu

IN_DIM = 768
HID_DIM = 256
OUT_DIM = 2
OUT_PAD = 128          # pad the 2-wide second matmul to a full MXU lane width
OUT_STORE = 8          # lanes actually written back to HBM (>= OUT_DIM)
TB_DEFAULT = 2048      # batch tile (rows); ~14 MiB double-buffered, fits all gens


def _round_up(x, m):
    return ((x + m - 1) // m) * m


def mlp_head_kernel(x_ref, w1_ref, b1_ref, w2_ref, b2_ref, out_ref):
    # x: (TB, 768) f32, w1: (768, 256) bf16, b1: (1, 256) f32,
    # w2: (256, 128) bf16, b2: (1, 128) f32, out: (TB, 8) f32.
    # In-kernel bf16 cast (free VPU op) -> bf16 MXU matmul, f32 accumulate.
    x = x_ref[...].astype(jnp.bfloat16)
    h = jnp.dot(x, w1_ref[...], preferred_element_type=jnp.float32) + b1_ref[...]
    # LeakyReLU(negative_slope=0.2) in f32.
    h = jnp.where(h > 0, h, 0.2 * h)
    # Second linear on bf16 operands, f32 accumulate, f32 bias.
    o = jnp.dot(h.astype(jnp.bfloat16), w2_ref[...],
                preferred_element_type=jnp.float32) + b2_ref[...]
    # ReLU.
    o = jnp.maximum(o, 0.0)
    # Narrow store: only the first OUT_STORE lanes go back to HBM.
    out_ref[...] = o[:, :OUT_STORE]


def prepare_params(w1, b1, w2, b2):
    """One-time parameter prep: bf16 casts + lane padding of the 2-wide head.

    w1: (768, 256), b1: (256,), w2: (256, 2), b2: (2,)  [already x @ W layout]
    """
    w1_bf16 = w1.astype(jnp.bfloat16)
    b1_2d = b1.reshape(1, HID_DIM).astype(jnp.float32)
    w2_pad = (jnp.zeros((HID_DIM, OUT_PAD), jnp.float32)
              .at[:, :OUT_DIM].set(w2).astype(jnp.bfloat16))
    b2_pad = jnp.zeros((1, OUT_PAD), jnp.float32).at[0, :OUT_DIM].set(b2)
    return w1_bf16, b1_2d, w2_pad, b2_pad


@functools.partial(jax.jit, static_argnames=("tb",))
def mlp_head_forward(feat, params, *, tb=TB_DEFAULT):
    """feat: (B, 768) float32.  params from prepare_params().

    Returns (as_preds, cs_preds), each (B,) float32.
    """
    w1_bf16, b1_2d, w2_pad, b2_pad = params
    B = feat.shape[0]

    # Batch tile: multiple of 8 sublanes, capped so that there are >=2 grid
    # tiles whenever B > 8 (lets v7x shard across its 2 TensorCores), and never
    # bigger than `tb` (VMEM budget).
    TB = max(8, min(tb, _round_up(pl.cdiv(B, 2), 8)))
    grid = (pl.cdiv(B, TB),)   # ragged last block handled by Pallas masking

    preds = pl.pallas_call(
        mlp_head_kernel,
        out_shape=jax.ShapeDtypeStruct((B, OUT_STORE), jnp.float32),
        grid_spec=pltpu.PrefetchScalarGridSpec(
            num_scalar_prefetch=0,
            grid=grid,
            in_specs=[
                # Streamed, double-buffered f32 batch tiles (cast in-kernel).
                pl.BlockSpec((TB, IN_DIM), lambda i: (i, 0)),
                # Weights / biases stay resident (same block every step).
                pl.BlockSpec((IN_DIM, HID_DIM), lambda i: (0, 0)),
                pl.BlockSpec((1, HID_DIM), lambda i: (0, 0)),
                pl.BlockSpec((HID_DIM, OUT_PAD), lambda i: (0, 0)),
                pl.BlockSpec((1, OUT_PAD), lambda i: (0, 0)),
            ],
            # Narrow (8-lane) f32 output store; last dim == full array dim.
            out_specs=pl.BlockSpec((TB, OUT_STORE), lambda i: (i, 0)),
        ),
        compiler_params=pltpu.CompilerParams(
            # Batch tiles are independent -> let v7x shard them across its 2 TCs.
            dimension_semantics=("parallel",),
            vmem_limit_bytes=32 * 1024 * 1024,
        ),
    )(feat.astype(jnp.float32), w1_bf16, b1_2d, w2_pad, b2_pad)

    as_preds = preds[:, 0]
    cs_preds = preds[:, 1]
    return as_preds, cs_preds


def init_params(key):
    """Deterministic init roughly matching nn.Linear defaults (uniform +-1/sqrt(fan_in))."""
    k1, k2, k3, k4 = jax.random.split(key, 4)
    bound1 = 1.0 / jnp.sqrt(IN_DIM)
    bound2 = 1.0 / jnp.sqrt(HID_DIM)
    w1 = jax.random.uniform(k1, (IN_DIM, HID_DIM), jnp.float32, -bound1, bound1)
    b1 = jax.random.uniform(k2, (HID_DIM,), jnp.float32, -bound1, bound1)
    w2 = jax.random.uniform(k3, (HID_DIM, OUT_DIM), jnp.float32, -bound2, bound2)
    b2 = jax.random.uniform(k4, (OUT_DIM,), jnp.float32, -bound2, bound2)
    return w1, b1, w2, b2


def reference_forward(feat, w1, b1, w2, b2):
    """Pure-JAX reference with the same bf16-operand / f32-accumulate recipe."""
    h = jnp.dot(feat.astype(jnp.bfloat16), w1.astype(jnp.bfloat16),
                preferred_element_type=jnp.float32) + b1
    h = jnp.where(h > 0, h, 0.2 * h)
    o = jnp.dot(h.astype(jnp.bfloat16), w2.astype(jnp.bfloat16),
                preferred_element_type=jnp.float32) + b2
    o = jnp.maximum(o, 0.0)
    return o[:, 0], o[:, 1]


if __name__ == "__main__":
    key = jax.random.PRNGKey(0)
    kx, kp = jax.random.split(key)

    w1, b1, w2, b2 = init_params(kp)
    params = prepare_params(w1, b1, w2, b2)

    # Case 1: small batch, multiple of 8 sublanes.
    B = 8
    feat = jax.random.normal(kx, (B, IN_DIM), jnp.float32)
    as_preds, cs_preds = mlp_head_forward(feat, params)
    jax.block_until_ready((as_preds, cs_preds))
    ref_as, ref_cs = reference_forward(feat, w1, b1, w2, b2)
    assert as_preds.shape == (B,) and cs_preds.shape == (B,)
    assert jnp.allclose(as_preds, ref_as, atol=1e-2, rtol=1e-2)
    assert jnp.allclose(cs_preds, ref_cs, atol=1e-2, rtol=1e-2)

    # Case 2: ragged batch (exercises the masked ragged-last-block path and
    # a multi-tile grid: TB=8, grid=(2,)).
    B2 = 13
    feat2 = jax.random.normal(jax.random.PRNGKey(1), (B2, IN_DIM), jnp.float32)
    as2, cs2 = mlp_head_forward(feat2, params)
    jax.block_until_ready((as2, cs2))
    ref_as2, ref_cs2 = reference_forward(feat2, w1, b1, w2, b2)
    assert as2.shape == (B2,) and cs2.shape == (B2,)
    assert jnp.allclose(as2, ref_as2, atol=1e-2, rtol=1e-2)
    assert jnp.allclose(cs2, ref_cs2, atol=1e-2, rtol=1e-2)

    print("KERNEL_OK")
</pallas_src>

<mosaic_0001>
module attributes {stable_mosaic.version = 11 : i64} {
  func.func @mlp_head_kernel(%arg0: i32, %arg1: memref<8x768xf32, #tpu.memory_space<vmem>>, %arg2: memref<768x256xbf16, #tpu.memory_space<vmem>>, %arg3: memref<1x256xf32, #tpu.memory_space<vmem>>, %arg4: memref<256x128xbf16, #tpu.memory_space<vmem>>, %arg5: memref<1x128xf32, #tpu.memory_space<vmem>>, %arg6: memref<8x8xf32, #tpu.memory_space<vmem>>) attributes {dimension_semantics = [#tpu.dimension_semantics<parallel>], iteration_bounds = array<i64: 1>, scalar_prefetch = 0 : i64, scratch_operands = 0 : i64, tpu.core_type = #tpu.core_type<tc>, window_params = [{transform_indices = @transform_0, window_bounds = array<i64: 8, 768>}, {pipeline_mode = #tpu.pipeline_mode<synchronous>, transform_indices = @transform_1, window_bounds = array<i64: 768, 256>}, {pipeline_mode = #tpu.pipeline_mode<synchronous>, transform_indices = @transform_2, window_bounds = array<i64: 1, 256>}, {pipeline_mode = #tpu.pipeline_mode<synchronous>, transform_indices = @transform_3, window_bounds = array<i64: 256, 128>}, {pipeline_mode = #tpu.pipeline_mode<synchronous>, transform_indices = @transform_4, window_bounds = array<i64: 1, 128>}, {transform_indices = @transform_5, window_bounds = array<i64: 8, 8>}]} {
    %c0 = arith.constant 0 : index
    %c0_0 = arith.constant 0 : index
    %0 = vector.load %arg1[%c0, %c0_0] : memref<8x768xf32, #tpu.memory_space<vmem>>, vector<8x768xf32>
    %1 = arith.truncf %0 : vector<8x768xf32> to vector<8x768xbf16>
    %c0_1 = arith.constant 0 : index
    %c0_2 = arith.constant 0 : index
    %2 = vector.load %arg2[%c0_1, %c0_2] : memref<768x256xbf16, #tpu.memory_space<vmem>>, vector<768x256xbf16>
    %cst = arith.constant dense<0.000000e+00> : vector<8x256xf32>
    %3 = tpu.matmul %1, %2, %cst {dimension_numbers = #tpu.dot_dimension_numbers<[1], [0], [0], [1], [0, 0, 1, 1], [], []>} : vector<8x768xbf16>, vector<768x256xbf16>, vector<8x256xf32> -> vector<8x256xf32>
    %c0_3 = arith.constant 0 : index
    %c0_4 = arith.constant 0 : index
    %4 = vector.load %arg3[%c0_3, %c0_4] : memref<1x256xf32, #tpu.memory_space<vmem>>, vector<1x256xf32>
    %5 = vector.broadcast %4 : vector<1x256xf32> to vector<8x256xf32>
    %6 = arith.addf %3, %5 : vector<8x256xf32>
    %cst_5 = arith.constant 0.000000e+00 : f32
    %7 = vector.broadcast %cst_5 : f32 to vector<8x256xf32>
    %8 = arith.cmpf ogt, %6, %7 : vector<8x256xf32>
    %cst_6 = arith.constant 2.000000e-01 : f32
    %9 = vector.broadcast %cst_6 : f32 to vector<8x256xf32>
    %10 = arith.mulf %9, %6 : vector<8x256xf32>
    %11 = arith.select %8, %6, %10 : vector<8x256xi1>, vector<8x256xf32>
    %12 = arith.truncf %11 : vector<8x256xf32> to vector<8x256xbf16>
    %c0_7 = arith.constant 0 : index
    %c0_8 = arith.constant 0 : index
    %13 = vector.load %arg4[%c0_7, %c0_8] : memref<256x128xbf16, #tpu.memory_space<vmem>>, vector<256x128xbf16>
    %cst_9 = arith.constant dense<0.000000e+00> : vector<8x128xf32>
    %14 = tpu.matmul %12, %13, %cst_9 {dimension_numbers = #tpu.dot_dimension_numbers<[1], [0], [0], [1], [0, 0, 1, 1], [], []>} : vector<8x256xbf16>, vector<256x128xbf16>, vector<8x128xf32> -> vector<8x128xf32>
    %c0_10 = arith.constant 0 : index
    %c0_11 = arith.constant 0 : index
    %15 = vector.load %arg5[%c0_10, %c0_11] : memref<1x128xf32, #tpu.memory_space<vmem>>, vector<1x128xf32>
    %16 = vector.broadcast %15 : vector<1x128xf32> to vector<8x128xf32>
    %17 = arith.addf %14, %16 : vector<8x128xf32>
    %cst_12 = arith.constant 0.000000e+00 : f32
    %18 = vector.broadcast %cst_12 : f32 to vector<8x128xf32>
    %19 = arith.maximumf %17, %18 : vector<8x128xf32>
    %20 = vector.extract_strided_slice %19 {offsets = [0, 0], sizes = [8, 8], strides = [1, 1]} : vector<8x128xf32> to vector<8x8xf32>
    %c0_13 = arith.constant 0 : index
    %c0_14 = arith.constant 0 : index
    %21 = vector.load %arg6[%c0_13, %c0_14] : memref<8x8xf32, #tpu.memory_space<vmem>>, vector<8x8xf32>
    tpu.vector_store %arg6[%c0_13, %c0_14], %20 {strides = array<i32>} : memref<8x8xf32, #tpu.memory_space<vmem>>, vector<8x8xf32>,
    return
  }
  func.func @transform_0(%arg0: i32) -> (i32, i32) {
    %c0_i32 = arith.constant 0 : i32
    %c0_i32_0 = arith.constant 0 : i32
    return %arg0, %c0_i32 : i32, i32
  }
  func.func @transform_1(%arg0: i32) -> (i32, i32) {
    %c0_i32 = arith.constant 0 : i32
    %c0_i32_0 = arith.constant 0 : i32
    %c0_i32_1 = arith.constant 0 : i32
    return %c0_i32, %c0_i32_0 : i32, i32
  }
  func.func @transform_2(%arg0: i32) -> (i32, i32) {
    %c0_i32 = arith.constant 0 : i32
    %c0_i32_0 = arith.constant 0 : i32
    %c0_i32_1 = arith.constant 0 : i32
    return %c0_i32, %c0_i32_0 : i32, i32
  }
  func.func @transform_3(%arg0: i32) -> (i32, i32) {
    %c0_i32 = arith.constant 0 : i32
    %c0_i32_0 = arith.constant 0 : i32
    %c0_i32_1 = arith.constant 0 : i32
    return %c0_i32, %c0_i32_0 : i32, i32
  }
  func.func @transform_4(%arg0: i32) -> (i32, i32) {
    %c0_i32 = arith.constant 0 : i32
    %c0_i32_0 = arith.constant 0 : i32
    %c0_i32_1 = arith.constant 0 : i32
    return %c0_i32, %c0_i32_0 : i32, i32
  }
  func.func @transform_5(%arg0: i32) -> (i32, i32) {
    %c0_i32 = arith.constant 0 : i32
    %c0_i32_0 = arith.constant 0 : i32
    return %arg0, %c0_i32 : i32, i32
  }
}

</mosaic_0001>

<bundles_post_ra>
// kernel: mlp_head_forward.1
= control target key start
LH: loop header
LB: loop body
LE: loop exit
PB: predicated region body
PF: predicated region fallthrough
CT: control target
= control target key end

     0   :  { %10 = vsyncpa [#allocation3], 0  ;;  %s1756_s0 = inlined_call_operand.hbm [shape: f32[8,768], index: 0, kind: input, shape index: {}]   ;;  %s1757_s1 = inlined_call_operand.hbm [shape: bf16[768,256], index: 1, kind: input, shape index: {}]   ;;  %s1758_s2 = inlined_call_operand.hbm [shape: f32[1,256], index: 2, kind: input, shape index: {}]   ;;  %s1759_s3 = inlined_call_operand.hbm [shape: bf16[256,128], index: 3, kind: input, shape index: {}]   ;;  %s1760_s4 = inlined_call_operand.vmem [shape: f32[1,128], index: 4, kind: input, shape index: {}]   ;;  %s1761_s5 = inlined_call_operand.vmem [shape: f32[8,8], index: 5, kind: output, shape index: {}]  }
   0x1   :  { %11 = vsyncpa [#allocation5], 0  ;;  %s28_s20 = sshll.u32 %s1757_s1, 4  ;;  %s29_s20 = int_to_ptr.hbm [resolvable:$true] %s28_s20 }
   0x2   :  { %12 = vsyncpa [#allocation8], 0  ;;  %s1676_s21 = smov [#allocation4]   ;;  %s18_s25 = sshll.u32 %s1756_s0, 4  ;;  %s19_s25 = int_to_ptr.hbm [resolvable:$true] %s18_s25 }
   0x3   :  { %s30_s22 = sshll.u32 %s1676_s21, 4  ;;  %s1677_s26 = smov 128   ;;  %s31_s22 = int_to_ptr.vmem [resolvable:$true] %s30_s22 }
   0x4   :  { %s1678_s27 = smov 8   ;;  %s1679_s28 = smov [#allocation2]  }
   0x5   :  { %36 = dma.hbm_to_vmem [thread:$0]  %s29_s20, 12288, %s31_s22, [#allocation5], %s1677_s26, %s1677_s26, %s1678_s27  }
   0x6   :  { %s20_s29 = sshll.u32 %s1679_s28, 4  ;;  %s42_s7 = sshll.u32 %s1758_s2, 4  ;;  %s21_s29 = int_to_ptr.vmem [resolvable:$true] %s20_s29  ;;  %s43_s7 = int_to_ptr.hbm [resolvable:$true] %s42_s7 }
   0x7   :  { %23 = dma.hbm_to_vmem [thread:$0]  %s19_s25, 768, %s21_s29, [#allocation3]  }
   0x8   :  { %s52_s9 = sshll.u32 %s1759_s3, 4  ;;  %s1680_s10 = smov [#allocation6]   ;;  %s53_s9 = int_to_ptr.hbm [resolvable:$true] %s52_s9 }
   0x9   :  { %s44_s11 = sshll.u32 %s1680_s10, 4  ;;  %s1681_s0 = smov [#allocation7]   ;;  %s45_s11 = int_to_ptr.vmem [resolvable:$true] %s44_s11 }
   0xa   :  { %47 = dma.hbm_to_vmem [thread:$0]  %s43_s7, 32, %s45_s11, [#allocation5]  }
   0xb   :  { %s54_s12 = sshll.u32 %s1681_s0, 4  ;;  %s1682_s13 = smov 64   ;;  %s55_s12 = int_to_ptr.vmem [resolvable:$true] %s54_s12 }
   0xc   :  { %s1683_s14 = smov 4  }
   0xd   :  { %60 = dma.hbm_to_vmem [thread:$0]  %s53_s9, 2048, %s55_s12, [#allocation8], %s1682_s13, %s1682_s13, %s1683_s14  }
   0xe   :  { %1670 = dma.done.wait [#allocation3], 768  }
   0xf   :  { %1671 = vsyncadd [#allocation3], 4294966528 }
  0x10   :  { %1672 = dma.done.wait [#allocation5], 12320  }
  0x11   :  { %1673 = vsyncadd [#allocation5], 4294954976 }
  0x12   :  { %1674 = dma.done.wait [#allocation8], 2048  }
  0x13   :  { %1675 = vsyncadd [#allocation8], 4294965248  ;;  %v1063_v0 = vld [vmem:[#allocation4 + $0x70] sm:$0xf]  ;;  %v1468_v1 = vld [vmem:[#allocation4 + $0x74] sm:$0xf0] }
  0x14   :  { %v1127_v2 = vld [vmem:[#allocation4 + $0xf0] sm:$0xf]  ;;  %v1064_v3 = vor.u32 %v1468_v1, %v1063_v0  ;;  %v1484_v4 = vld [vmem:[#allocation4 + $0xf4] sm:$0xf0]  ;;  %v1055_v11 = vld [vmem:[#allocation4 + $0x60] sm:$0xf] }
  0x15   :  { %v1191_v5 = vld [vmem:[#allocation4 + $0x170] sm:$0xf]  ;;  %v1500_v6 = vld [vmem:[#allocation4 + $0x174] sm:$0xf0]  ;;  %v1128_v7 = vor.u32 %v1484_v4, %v1127_v2  ;;  %v1466_v13 = vld [vmem:[#allocation4 + $0x64] sm:$0xf0] }
  0x16   :  { %v1192_v8 = vor.u32 %v1500_v6, %v1191_v5  ;;  %v1255_v9 = vld [vmem:[#allocation4 + $0x1f0] sm:$0xf]  ;;  %v1516_v10 = vld [vmem:[#allocation4 + $0x1f4] sm:$0xf0]  ;;  %673 = vmatpush.bf16.msra.mxu0 %v1064_v3  ;;  %v1119_v14 = vld [vmem:[#allocation4 + $0xe0] sm:$0xf]  ;;  %v1056_v16 = vor.u32 %v1466_v13, %v1055_v11 }
  0x17   :  { %v1256_v12 = vor.u32 %v1516_v10, %v1255_v9  ;;  %v1482_v15 = vld [vmem:[#allocation4 + $0xe4] sm:$0xf0]  ;;  %686 = vmatpush.bf16.msra.mxu1 %v1128_v7  ;;  %v1183_v18 = vld [vmem:[#allocation4 + $0x160] sm:$0xf]  ;;  %v1047_v23 = vld [vmem:[#allocation4 + $0x50] sm:$0xf] }
  0x18   :  { %699 = vmatpush.bf16.msra.mxu2 %v1192_v8  ;;  %v1120_v17 = vor.u32 %v1482_v15, %v1119_v14  ;;  %v1498_v19 = vld [vmem:[#allocation4 + $0x164] sm:$0xf0]  ;;  %v1247_v20 = vld [vmem:[#allocation4 + $0x1e0] sm:$0xf]  ;;  %v1464_v24 = vld [vmem:[#allocation4 + $0x54] sm:$0xf0] }
  0x19   :  { %712 = vmatpush.bf16.msra.mxu3 %v1256_v12  ;;  %v1184_v21 = vor.u32 %v1498_v19, %v1183_v18  ;;  %v1514_v22 = vld [vmem:[#allocation4 + $0x1e4] sm:$0xf0]  ;;  %v1111_v26 = vld [vmem:[#allocation4 + $0xd0] sm:$0xf]  ;;  %v1480_v27 = vld [vmem:[#allocation4 + $0xd4] sm:$0xf0]  ;;  %v1048_v29 = vor.u32 %v1464_v24, %v1047_v23 }
  0x1a   :  { %v1248_v25 = vor.u32 %v1514_v22, %v1247_v20  ;;  %v1175_v28 = vld [vmem:[#allocation4 + $0x150] sm:$0xf]  ;;  %674 = vmatpush.bf16.msra.mxu0 %v1056_v16  ;;  %v1496_v30 = vld [vmem:[#allocation4 + $0x154] sm:$0xf0]  ;;  %v1112_v33 = vor.u32 %v1480_v27, %v1111_v26  ;;  %v1039_v35 = vld [vmem:[#allocation4 + $0x40] sm:$0xf] }
  0x1b   :  { %v1239_v31 = vld [vmem:[#allocation4 + $0x1d0] sm:$0xf]  ;;  %v1512_v32 = vld [vmem:[#allocation4 + $0x1d4] sm:$0xf0]  ;;  %687 = vmatpush.bf16.msra.mxu1 %v1120_v17  ;;  %v1176_v34 = vor.u32 %v1496_v30, %v1175_v28  ;;  %v1462_v36 = vld [vmem:[#allocation4 + $0x44] sm:$0xf0] }
  0x1c   :  { %700 = vmatpush.bf16.msra.mxu2 %v1184_v21  ;;  %v1103_v37 = vld [vmem:[#allocation4 + $0xc0] sm:$0xf]  ;;  %v1240_v38 = vor.u32 %v1512_v32, %v1239_v31  ;;  %v1478_v39 = vld [vmem:[#allocation4 + $0xc4] sm:$0xf0]  ;;  %v1040_v44 = vor.u32 %v1462_v36, %v1039_v35  ;;  %v1031_v47 = vld [vmem:[#allocation4 + $0x30] sm:$0xf] }
  0x1d   :  { %713 = vmatpush.bf16.msra.mxu3 %v1248_v25  ;;  %v1167_v40 = vld [vmem:[#allocation4 + $0x140] sm:$0xf]  ;;  %v1494_v41 = vld [vmem:[#allocation4 + $0x144] sm:$0xf0]  ;;  %v1104_v45 = vor.u32 %v1478_v39, %v1103_v37  ;;  %v1460_v48 = vld [vmem:[#allocation4 + $0x34] sm:$0xf0] }
  0x1e   :  { %v1231_v42 = vld [vmem:[#allocation4 + $0x1c0] sm:$0xf]  ;;  %v1510_v43 = vld [vmem:[#allocation4 + $0x1c4] sm:$0xf0]  ;;  %675 = vmatpush.bf16.msra.mxu0 %v1048_v29  ;;  %v1168_v46 = vor.u32 %v1494_v41, %v1167_v40  ;;  %v1095_v49 = vld [vmem:[#allocation4 + $0xb0] sm:$0xf]  ;;  %v1032_v56 = vor.u32 %v1460_v48, %v1031_v47 }
  0x1f   :  { %688 = vmatpush.bf16.msra.mxu1 %v1112_v33  ;;  %v1232_v50 = vor.u32 %v1510_v43, %v1231_v42  ;;  %v1476_v51 = vld [vmem:[#allocation4 + $0xb4] sm:$0xf0]  ;;  %v1159_v52 = vld [vmem:[#allocation4 + $0x130] sm:$0xf]  ;;  %v1023_v59 = vld [vmem:[#allocation4 + $0x20] sm:$0xf] }
  0x20   :  { %701 = vmatpush.bf16.msra.mxu2 %v1176_v34  ;;  %v1492_v53 = vld [vmem:[#allocation4 + $0x134] sm:$0xf0]  ;;  %v1223_v54 = vld [vmem:[#allocation4 + $0x1b0] sm:$0xf]  ;;  %v1096_v57 = vor.u32 %v1476_v51, %v1095_v49  ;;  %v1458_v60 = vld [vmem:[#allocation4 + $0x24] sm:$0xf0] }
  0x21   :  { %714 = vmatpush.bf16.msra.mxu3 %v1240_v38  ;;  %v1508_v55 = vld [vmem:[#allocation4 + $0x1b4] sm:$0xf0]  ;;  %v1160_v58 = vor.u32 %v1492_v53, %v1159_v52  ;;  %v1087_v61 = vld [vmem:[#allocation4 + $0xa0] sm:$0xf]  ;;  %v1474_v63 = vld [vmem:[#allocation4 + $0xa4] sm:$0xf0]  ;;  %v1024_v4 = vor.u32 %v1458_v60, %v1023_v59 }
  0x22   :  { %676 = vmatpush.bf16.msra.mxu0 %v1040_v44  ;;  %v1224_v62 = vor.u32 %v1508_v55, %v1223_v54  ;;  %v1151_v0 = vld [vmem:[#allocation4 + $0x120] sm:$0xf]  ;;  %v1490_v1 = vld [vmem:[#allocation4 + $0x124] sm:$0xf0]  ;;  %v1088_v5 = vor.u32 %v1474_v63, %v1087_v61  ;;  %v1015_v7 = vld [vmem:[#allocation4 + $0x10] sm:$0xf] }
  0x23   :  { %689 = vmatpush.bf16.msra.mxu1 %v1104_v45  ;;  %v1215_v2 = vld [vmem:[#allocation4 + $0x1a0] sm:$0xf]  ;;  %v1506_v3 = vld [vmem:[#allocation4 + $0x1a4] sm:$0xf0]  ;;  %v1152_v6 = vor.u32 %v1490_v1, %v1151_v0  ;;  %v1456_v8 = vld [vmem:[#allocation4 + $0x14] sm:$0xf0] }
  0x24   :  { %702 = vmatpush.bf16.msra.mxu2 %v1168_v46  ;;  %v1079_v9 = vld [vmem:[#allocation4 + $0x90] sm:$0xf]  ;;  %v1216_v10 = vor.u32 %v1506_v3, %v1215_v2  ;;  %v1472_v11 = vld [vmem:[#allocation4 + $0x94] sm:$0xf0]  ;;  %v1016_v16 = vor.u32 %v1456_v8, %v1015_v7  ;;  %v1007_v17 = vld [vmem:[#allocation4] sm:$0xf] }
  0x25   :  { %715 = vmatpush.bf16.msra.mxu3 %v1232_v50  ;;  %v1143_v12 = vld [vmem:[#allocation4 + $0x110] sm:$0xf]  ;;  %v1488_v13 = vld [vmem:[#allocation4 + $0x114] sm:$0xf0]  ;;  %v1454_v18 = vld [vmem:[#allocation4 + $0x4] sm:$0xf0]  ;;  %v1080_v19 = vor.u32 %v1472_v11, %v1079_v9 }
  0x26   :  { %677 = vmatpush.bf16.msra.mxu0 %v1032_v56  ;;  %v1207_v14 = vld [vmem:[#allocation4 + $0x190] sm:$0xf]  ;;  %v1504_v15 = vld [vmem:[#allocation4 + $0x194] sm:$0xf0]  ;;  %v1144_v20 = vor.u32 %v1488_v13, %v1143_v12  ;;  %v1071_v21 = vld [vmem:[#allocation4 + $0x80] sm:$0xf]  ;;  %v1008_v31 = vor.u32 %v1454_v18, %v1007_v17 }
  0x27   :  { %690 = vmatpush.bf16.msra.mxu1 %v1096_v57  ;;  %v1470_v22 = vld [vmem:[#allocation4 + $0x84] sm:$0xf0]  ;;  %v1135_v23 = vld [vmem:[#allocation4 + $0x100] sm:$0xf]  ;;  %v1208_v24 = vor.u32 %v1504_v15, %v1207_v14  ;;  %v1319_v28 = vld [vmem:[#allocation4 + $0x270] sm:$0xf] }
  0x28   :  { %703 = vmatpush.bf16.msra.mxu2 %v1160_v58  ;;  %v1486_v25 = vld [vmem:[#allocation4 + $0x104] sm:$0xf0]  ;;  %v1199_v26 = vld [vmem:[#allocation4 + $0x180] sm:$0xf]  ;;  %v1532_v29 = vld [vmem:[#allocation4 + $0x274] sm:$0xf0]  ;;  %v1072_v35 = vor.u32 %v1470_v22, %v1071_v21 }
  0x29   :  { %716 = vmatpush.bf16.msra.mxu3 %v1224_v62  ;;  %v1502_v27 = vld [vmem:[#allocation4 + $0x184] sm:$0xf0]  ;;  %v1383_v30 = vld [vmem:[#allocation4 + $0x2f0] sm:$0xf]  ;;  %v1548_v32 = vld [vmem:[#allocation4 + $0x2f4] sm:$0xf0]  ;;  %v1136_v36 = vor.u32 %v1486_v25, %v1135_v23  ;;  %v1320_v40 = vor.u32 %v1532_v29, %v1319_v28 }
  0x2a   :  { %678 = vmatpush.bf16.msra.mxu0 %v1024_v4  ;;  %v1467_v33 = vld [vmem:[#allocation4 + $0x74] sm:$0xf]  ;;  %v1065_v34 = vld [vmem:[#allocation4 + $0x78] sm:$0xf0]  ;;  %v1200_v39 = vor.u32 %v1502_v27, %v1199_v26  ;;  %v1384_v41 = vor.u32 %v1548_v32, %v1383_v30  ;;  %v1311_v43 = vld [vmem:[#allocation4 + $0x260] sm:$0xf] }
  0x2b   :  { %691 = vmatpush.bf16.msra.mxu1 %v1088_v5  ;;  %v1483_v37 = vld [vmem:[#allocation4 + $0xf4] sm:$0xf]  ;;  %v1129_v38 = vld [vmem:[#allocation4 + $0xf8] sm:$0xf0]  ;;  %v1068_v42 = vor.u32 %v1467_v33, %v1065_v34  ;;  %v1530_v44 = vld [vmem:[#allocation4 + $0x264] sm:$0xf0] }
  0x2c   :  { %704 = vmatpush.bf16.msra.mxu2 %v1152_v6  ;;  %v1375_v45 = vld [vmem:[#allocation4 + $0x2e0] sm:$0xf]  ;;  %v1132_v46 = vor.u32 %v1483_v37, %v1129_v38  ;;  %v1546_v47 = vld [vmem:[#allocation4 + $0x2e4] sm:$0xf0]  ;;  %v1465_v48 = vld [vmem:[#allocation4 + $0x64] sm:$0xf]  ;;  %v1312_v53 = vor.u32 %v1530_v44, %v1311_v43 }
  0x2d   :  { %717 = vmatpush.bf16.msra.mxu3 %v1216_v10  ;;  %v1057_v49 = vld [vmem:[#allocation4 + $0x68] sm:$0xf0]  ;;  %v1481_v50 = vld [vmem:[#allocation4 + $0xe4] sm:$0xf]  ;;  %v79_v52 = vld [vmem:[#allocation2] sm:$0xff]  ;;  %v1376_v57 = vor.u32 %v1546_v47, %v1375_v45  ;;  %vm996_vm2 = vcmask 64512  }
  0x2e   :  { %679 = vmatpush.bf16.msra.mxu0 %v1016_v16  ;;  %v1121_v51 = vld [vmem:[#allocation4 + $0xe8] sm:$0xf0]  ;;  %v1303_v54 = vld [vmem:[#allocation4 + $0x250] sm:$0xf]  ;;  %v1528_v55 = vld [vmem:[#allocation4 + $0x254] sm:$0xf0]  ;;  %v1726_v56 = vpack.c.bf16 %v79_v52, %v79_v52  ;;  %v1060_v58 = vor.u32 %v1465_v48, %v1057_v49 }
  0x2f   :  { %692 = vmatpush.bf16.msra.mxu1 %v1080_v19  ;;  %v1367_v59 = vld [vmem:[#allocation4 + $0x2d0] sm:$0xf]  ;;  %v1544_v60 = vld [vmem:[#allocation4 + $0x2d4] sm:$0xf0]  ;;  %v1463_v61 = vld [vmem:[#allocation4 + $0x54] sm:$0xf]  ;;  %v1124_v62 = vor.u32 %v1481_v50, %v1121_v51  ;;  %v1304_v6 = vor.u32 %v1528_v55, %v1303_v54 }
  0x30   :  { %705 = vmatpush.bf16.msra.mxu2 %v1144_v20  ;;  %v1049_v63 = vld [vmem:[#allocation4 + $0x58] sm:$0xf0]  ;;  %v81_v1 = vld [vmem:[#allocation2 + $0x10] sm:$0xff]  ;;  %v1479_v2 = vld [vmem:[#allocation4 + $0xd4] sm:$0xf]  ;;  %v1368_v8 = vor.u32 %v1544_v60, %v1367_v59 }
  0x31   :  { %718 = vmatpush.bf16.msra.mxu3 %v1208_v24  ;;  %v80_v0 = vld [vmem:[#allocation2 + $0x8] sm:$0xff]  ;;  %v1731_v5 = vpack.c.bf16 %v81_v1, %v81_v1  ;;  %v1295_v7 = vld [vmem:[#allocation4 + $0x240] sm:$0xf]  ;;  %v1052_v9 = vor.u32 %v1463_v61, %v1049_v63  ;;  %v1526_v10 = vld [vmem:[#allocation4 + $0x244] sm:$0xf0] }
  0x32   :  { %680 = vmatpush.bf16.msra.mxu0 %v1008_v31  ;;  %v1113_v3 = vld [vmem:[#allocation4 + $0xd8] sm:$0xf0]  ;;  %v1729_v4 = vpack.c.bf16 %v80_v0, %v80_v0  ;;  %v1359_v11 = vld [vmem:[#allocation4 + $0x2c0] sm:$0xf]  ;;  %v82_v12 = vld [vmem:[#allocation2 + $0x18] sm:$0xff]  ;;  %v1296_v20 = vor.u32 %v1526_v10, %v1295_v7 }
  0x33   :  { %693 = vmatpush.bf16.msra.mxu1 %v1072_v35  ;;  %v1116_v13 = vor.u32 %v1479_v2, %v1113_v3  ;;  %v1542_v14 = vld [vmem:[#allocation4 + $0x2c4] sm:$0xf0]  ;;  %v1461_v15 = vld [vmem:[#allocation4 + $0x44] sm:$0xf]  ;;  %v1041_v16 = vld [vmem:[#allocation4 + $0x48] sm:$0xf0]  ;;  %v1734_v17 = vpack.c.bf16 %v82_v12, %v82_v12 }
  0x34   :  { %706 = vmatpush.bf16.msra.mxu2 %v1136_v36  ;;  %v1477_v18 = vld [vmem:[#allocation4 + $0xc4] sm:$0xf]  ;;  %v1105_v19 = vld [vmem:[#allocation4 + $0xc8] sm:$0xf0]  ;;  %v1360_v21 = vor.u32 %v1542_v14, %v1359_v11  ;;  %v1044_v22 = vor.u32 %v1461_v15, %v1041_v16  ;;  %v1287_v23 = vld [vmem:[#allocation4 + $0x230] sm:$0xf] }
  0x35   :  { %719 = vmatpush.bf16.msra.mxu3 %v1200_v39  ;;  %681 = vmatmul.bf16.vlgmr.msra.gmra.mxu0 %v1726_v56  ;;  %v1524_v24 = vld [vmem:[#allocation4 + $0x234] sm:$0xf0]  ;;  %v1351_v25 = vld [vmem:[#allocation4 + $0x2b0] sm:$0xf]  ;;  %v1108_v26 = vor.u32 %v1477_v18, %v1105_v19  ;;  %v1459_v28 = vld [vmem:[#allocation4 + $0x34] sm:$0xf] }
  0x36   :  { %725 = vmatpush.bf16.msrb.mxu0 %v1320_v40  ;;  %694 = vmatmul.bf16.vlgmr.msra.gmra.mxu1 %v1729_v4  ;;  %v1540_v27 = vld [vmem:[#allocation4 + $0x2b4] sm:$0xf0]  ;;  %v1033_v29 = vld [vmem:[#allocation4 + $0x38] sm:$0xf0]  ;;  %v1475_v30 = vld [vmem:[#allocation4 + $0xb4] sm:$0xf]  ;;  %v1288_v32 = vor.u32 %v1524_v24, %v1287_v23 }
  0x37   :  { %738 = vmatpush.bf16.msrb.mxu1 %v1384_v41  ;;  %707 = vmatmul.bf16.vlgmr.msra.gmra.mxu2 %v1731_v5  ;;  %v1097_v31 = vld [vmem:[#allocation4 + $0xb8] sm:$0xf0]  ;;  %v1352_v33 = vor.u32 %v1540_v27, %v1351_v25  ;;  %v1036_v34 = vor.u32 %v1459_v28, %v1033_v29  ;;  %v1279_v35 = vld [vmem:[#allocation4 + $0x220] sm:$0xf]  ;;  %v1522_v36 = vld [vmem:[#allocation4 + $0x224] sm:$0xf0] }
  0x38   :  { %751 = vmatpush.bf16.msrb.mxu2 %v1068_v42  ;;  %720 = vmatmul.bf16.vlgmr.msra.gmra.mxu3 %v1734_v17  ;;  %v1343_v37 = vld [vmem:[#allocation4 + $0x2a0] sm:$0xf]  ;;  %v1100_v38 = vor.u32 %v1475_v30, %v1097_v31  ;;  %v1538_v39 = vld [vmem:[#allocation4 + $0x2a4] sm:$0xf0]  ;;  %v1457_v40 = vld [vmem:[#allocation4 + $0x24] sm:$0xf]  ;;  %v1280_v44 = vor.u32 %v1522_v36, %v1279_v35 }
  0x39   :  { %764 = vmatpush.bf16.msrb.mxu3 %v1132_v46  ;;  %v1025_v41 = vld [vmem:[#allocation4 + $0x28] sm:$0xf0]  ;;  %v1473_v42 = vld [vmem:[#allocation4 + $0xa4] sm:$0xf]  ;;  %v1344_v45 = vor.u32 %v1538_v39, %v1343_v37  ;;  %v1271_v47 = vld [vmem:[#allocation4 + $0x210] sm:$0xf] }
  0x3a   :  { %726 = vmatpush.bf16.msrb.mxu0 %v1312_v53  ;;  %v1089_v43 = vld [vmem:[#allocation4 + $0xa8] sm:$0xf0]  ;;  %v1028_v46 = vor.u32 %v1457_v40, %v1025_v41  ;;  %v1520_v48 = vld [vmem:[#allocation4 + $0x214] sm:$0xf0]  ;;  %v1335_v49 = vld [vmem:[#allocation4 + $0x290] sm:$0xf] }
  0x3b   :  { %739 = vmatpush.bf16.msrb.mxu1 %v1376_v57  ;;  %v1092_v50 = vor.u32 %v1473_v42, %v1089_v43  ;;  %v1536_v51 = vld [vmem:[#allocation4 + $0x294] sm:$0xf0]  ;;  %v1455_v52 = vld [vmem:[#allocation4 + $0x14] sm:$0xf]  ;;  %v1017_v53 = vld [vmem:[#allocation4 + $0x18] sm:$0xf0]  ;;  %v1272_v57 = vor.u32 %v1520_v48, %v1271_v47 }
  0x3c   :  { %752 = vmatpush.bf16.msrb.mxu2 %v1060_v58  ;;  %v1471_v54 = vld [vmem:[#allocation4 + $0x94] sm:$0xf]  ;;  %v1081_v55 = vld [vmem:[#allocation4 + $0x98] sm:$0xf0]  ;;  %v1263_v58 = vld [vmem:[#allocation4 + $0x200] sm:$0xf]  ;;  %v1336_v60 = vor.u32 %v1536_v51, %v1335_v49  ;;  %v1020_v61 = vor.u32 %v1455_v52, %v1017_v53 }
  0x3d   :  { %765 = vmatpush.bf16.msrb.mxu3 %v1124_v62  ;;  %v1518_v59 = vld [vmem:[#allocation4 + $0x204] sm:$0xf0]  ;;  %v1327_v62 = vld [vmem:[#allocation4 + $0x280] sm:$0xf]  ;;  %v1453_v0 = vld [vmem:[#allocation4 + $0x4] sm:$0xf]  ;;  %v1084_v1 = vor.u32 %v1471_v54, %v1081_v55 }
  0x3e   :  { %727 = vmatpush.bf16.msrb.mxu0 %v1304_v6  ;;  %v1534_v63 = vld [vmem:[#allocation4 + $0x284] sm:$0xf0]  ;;  %v1009_v2 = vld [vmem:[#allocation4 + $0x8] sm:$0xf0]  ;;  %v1469_v3 = vld [vmem:[#allocation4 + $0x84] sm:$0xf]  ;;  %v1264_v10 = vor.u32 %v1518_v59, %v1263_v58 }
  0x3f   :  { %740 = vmatpush.bf16.msrb.mxu1 %v1368_v8  ;;  %v1073_v6 = vld [vmem:[#allocation4 + $0x88] sm:$0xf0]  ;;  %v1499_v7 = vld [vmem:[#allocation4 + $0x174] sm:$0xf]  ;;  %v1193_v8 = vld [vmem:[#allocation4 + $0x178] sm:$0xf0]  ;;  %v1328_v14 = vor.u32 %v1534_v63, %v1327_v62  ;;  %v1012_v15 = vor.u32 %v1453_v0, %v1009_v2 }
  0x40   :  { %753 = vmatpush.bf16.msrb.mxu2 %v1052_v9  ;;  %v1515_v9 = vld [vmem:[#allocation4 + $0x1f4] sm:$0xf]  ;;  %v1257_v11 = vld [vmem:[#allocation4 + $0x1f8] sm:$0xf0]  ;;  %v1497_v25 = vld [vmem:[#allocation4 + $0x164] sm:$0xf] }
  0x41   :  { %766 = vmatpush.bf16.msrb.mxu3 %v1116_v13  ;;  %v1531_v12 = vld [vmem:[#allocation4 + $0x274] sm:$0xf]  ;;  %v1321_v13 = vld [vmem:[#allocation4 + $0x278] sm:$0xf0]  ;;  %v1260_v23 = vor.u32 %v1515_v9, %v1257_v11  ;;  %v1513_v27 = vld [vmem:[#allocation4 + $0x1e4] sm:$0xf] }
  0x42   :  { %728 = vmatpush.bf16.msrb.mxu0 %v1296_v20  ;;  %v1547_v16 = vld [vmem:[#allocation4 + $0x2f4] sm:$0xf]  ;;  %v1385_v18 = vld [vmem:[#allocation4 + $0x2f8] sm:$0xf0]  ;;  %v1076_v20 = vor.u32 %v1469_v3, %v1073_v6  ;;  %v1324_v24 = vor.u32 %v1531_v12, %v1321_v13  ;;  %v1249_v30 = vld [vmem:[#allocation4 + $0x1e8] sm:$0xf0] }
  0x43   :  { %741 = vmatpush.bf16.msrb.mxu1 %v1360_v21  ;;  %v83_v19 = vld [vmem:[#allocation2 + $0x20] sm:$0xff]  ;;  %v1196_v21 = vor.u32 %v1499_v7, %v1193_v8  ;;  %v1388_v28 = vor.u32 %v1547_v16, %v1385_v18  ;;  %v1529_v31 = vld [vmem:[#allocation4 + $0x264] sm:$0xf]  ;;  %v1377_v35 = vld [vmem:[#allocation4 + $0x2e8] sm:$0xf0]  ;;  %v1252_v37 = vor.u32 %v1513_v27, %v1249_v30 }
  0x44   :  { %754 = vmatpush.bf16.msrb.mxu2 %v1044_v22  ;;  %v84_v22 = vld [vmem:[#allocation2 + $0x28] sm:$0xff]  ;;  %v1738_v29 = vpack.c.bf16 %v83_v19, %v83_v19  ;;  %v1495_v39 = vld [vmem:[#allocation4 + $0x154] sm:$0xf]  ;;  %v1493_v51 = vld [vmem:[#allocation4 + $0x144] sm:$0xf] }
  0x45   :  { %767 = vmatpush.bf16.msrb.mxu3 %v1108_v26  ;;  %v1185_v26 = vld [vmem:[#allocation4 + $0x168] sm:$0xf0]  ;;  %v1177_v40 = vld [vmem:[#allocation4 + $0x158] sm:$0xf0]  ;;  %v1511_v41 = vld [vmem:[#allocation4 + $0x1d4] sm:$0xf] }
  0x46   :  { %729 = vmatpush.bf16.msrb.mxu0 %v1288_v32  ;;  %v1313_v32 = vld [vmem:[#allocation4 + $0x268] sm:$0xf0]  ;;  %v1188_v36 = vor.u32 %v1497_v25, %v1185_v26  ;;  %v1241_v43 = vld [vmem:[#allocation4 + $0x1d8] sm:$0xf0]  ;;  %v1180_v48 = vor.u32 %v1495_v39, %v1177_v40  ;;  %v1509_v53 = vld [vmem:[#allocation4 + $0x1c4] sm:$0xf] }
  0x47   :  { %742 = vmatpush.bf16.msrb.mxu1 %v1352_v33  ;;  %v1740_v33 = vpack.c.bf16 %v84_v22, %v84_v22  ;;  %v1369_v47 = vld [vmem:[#allocation4 + $0x2d8] sm:$0xf0]  ;;  %v1244_v49 = vor.u32 %v1511_v41, %v1241_v43  ;;  %v1169_v52 = vld [vmem:[#allocation4 + $0x148] sm:$0xf0]  ;;  %v1541_v59 = vld [vmem:[#allocation4 + $0x2c4] sm:$0xf] }
  0x48   :  { %755 = vmatpush.bf16.msrb.mxu2 %v1036_v34  ;;  %v1545_v34 = vld [vmem:[#allocation4 + $0x2e4] sm:$0xf]  ;;  %v1233_v55 = vld [vmem:[#allocation4 + $0x1c8] sm:$0xf0]  ;;  %v1491_v62 = vld [vmem:[#allocation4 + $0x134] sm:$0xf] }
  0x49   :  { %768 = vmatpush.bf16.msrb.mxu3 %v1100_v38  ;;  %v1316_v38 = vor.u32 %v1529_v31, %v1313_v32  ;;  %v1380_v42 = vor.u32 %v1545_v34, %v1377_v35  ;;  %v1297_v58 = vld [vmem:[#allocation4 + $0x248] sm:$0xf0]  ;;  %v1161_v63 = vld [vmem:[#allocation4 + $0x138] sm:$0xf0]  ;;  %v1507_v0 = vld [vmem:[#allocation4 + $0x1b4] sm:$0xf] }
  0x4a   :  { %730 = vmatpush.bf16.msrb.mxu0 %v1280_v44  ;;  %v1527_v44 = vld [vmem:[#allocation4 + $0x254] sm:$0xf]  ;;  %v1225_v2 = vld [vmem:[#allocation4 + $0x1b8] sm:$0xf0]  ;;  %v1164_v9 = vor.u32 %v1491_v62, %v1161_v63  ;;  %v1489_v12 = vld [vmem:[#allocation4 + $0x124] sm:$0xf] }
  0x4b   :  { %743 = vmatpush.bf16.msrb.mxu1 %v1344_v45  ;;  %v1305_v45 = vld [vmem:[#allocation4 + $0x258] sm:$0xf0]  ;;  %v1523_v3 = vld [vmem:[#allocation4 + $0x234] sm:$0xf]  ;;  %v1153_v13 = vld [vmem:[#allocation4 + $0x128] sm:$0xf0] }
  0x4c   :  { %756 = vmatpush.bf16.msrb.mxu2 %v1028_v46  ;;  %v1543_v46 = vld [vmem:[#allocation4 + $0x2d4] sm:$0xf]  ;;  %v1289_v6 = vld [vmem:[#allocation4 + $0x238] sm:$0xf0]  ;;  %v1217_v16 = vld [vmem:[#allocation4 + $0x1a8] sm:$0xf0]  ;;  %v1156_v22 = vor.u32 %v1489_v12, %v1153_v13 }
  0x4d   :  { %769 = vmatpush.bf16.msrb.mxu3 %v1092_v50  ;;  %v1308_v50 = vor.u32 %v1527_v44, %v1305_v45  ;;  %v1372_v54 = vor.u32 %v1543_v46, %v1369_v47  ;;  %v1539_v7 = vld [vmem:[#allocation4 + $0x2b4] sm:$0xf]  ;;  %v1353_v8 = vld [vmem:[#allocation4 + $0x2b8] sm:$0xf0]  ;;  %v1292_v11 = vor.u32 %v1523_v3, %v1289_v6  ;;  %v1521_v18 = vld [vmem:[#allocation4 + $0x224] sm:$0xf] }
  0x4e   :  { %731 = vmatpush.bf16.msrb.mxu0 %v1272_v57  ;;  %v1525_v57 = vld [vmem:[#allocation4 + $0x244] sm:$0xf]  ;;  %v1281_v19 = vld [vmem:[#allocation4 + $0x228] sm:$0xf0]  ;;  %v1487_v25 = vld [vmem:[#allocation4 + $0x114] sm:$0xf] }
  0x4f   :  { %744 = vmatpush.bf16.msrb.mxu1 %v1336_v60  ;;  %v1172_v60 = vor.u32 %v1493_v51, %v1169_v52  ;;  %v1145_v26 = vld [vmem:[#allocation4 + $0x118] sm:$0xf0]  ;;  %v1503_v27 = vld [vmem:[#allocation4 + $0x194] sm:$0xf]  ;;  %v1485_v39 = vld [vmem:[#allocation4 + $0x104] sm:$0xf] }
  0x50   :  { %757 = vmatpush.bf16.msrb.mxu2 %v1020_v61  ;;  %v1236_v61 = vor.u32 %v1509_v53, %v1233_v55  ;;  %v1209_v30 = vld [vmem:[#allocation4 + $0x198] sm:$0xf0]  ;;  %v1519_v31 = vld [vmem:[#allocation4 + $0x214] sm:$0xf]  ;;  %v1137_v40 = vld [vmem:[#allocation4 + $0x108] sm:$0xf0] }
  0x51   :  { %770 = vmatpush.bf16.msrb.mxu3 %v1084_v1  ;;  %v1273_v32 = vld [vmem:[#allocation4 + $0x218] sm:$0xf0]  ;;  %v1535_v34 = vld [vmem:[#allocation4 + $0x294] sm:$0xf]  ;;  %v1501_v41 = vld [vmem:[#allocation4 + $0x184] sm:$0xf] }
  0x52   :  { %732 = vmatpush.bf16.msrb.mxu0 %v1264_v10  ;;  %v1228_v10 = vor.u32 %v1507_v0, %v1225_v2  ;;  %v1337_v35 = vld [vmem:[#allocation4 + $0x298] sm:$0xf0]  ;;  %v1201_v43 = vld [vmem:[#allocation4 + $0x188] sm:$0xf0]  ;;  %v1517_v44 = vld [vmem:[#allocation4 + $0x204] sm:$0xf] }
  0x53   :  { %745 = vmatpush.bf16.msrb.mxu1 %v1328_v14  ;;  %v1505_v14 = vld [vmem:[#allocation4 + $0x1a4] sm:$0xf]  ;;  %v1265_v45 = vld [vmem:[#allocation4 + $0x208] sm:$0xf0]  ;;  %v1556_v52 = vld [vmem:[#allocation7 + $0x38] sm:$0xff] }
  0x54   :  { %758 = vmatpush.bf16.msrb.mxu2 %v1012_v15  ;;  %v1356_v15 = vor.u32 %v1539_v7, %v1353_v8  ;;  %v1533_v46 = vld [vmem:[#allocation4 + $0x284] sm:$0xf]  ;;  %v1329_v47 = vld [vmem:[#allocation4 + $0x288] sm:$0xf0]  ;;  %v1555_v53 = vld [vmem:[#allocation7 + $0x30] sm:$0xff] }
  0x55   :  { %771 = vmatpush.bf16.msrb.mxu3 %v1076_v20  ;;  %733 = vmatmul.bf16.vlgmr.msrb.gmra.mxu0 %v1738_v29  ;;  %v1537_v20 = vld [vmem:[#allocation4 + $0x2a4] sm:$0xf]  ;;  %v1332_v51 = vor.u32 %v1533_v46, %v1329_v47  ;;  %v1559_v13 = vld [vmem:[#allocation7 + $0x50] sm:$0xff] }
  0x56   :  { %777 = vmatpush.bf16.msra.mxu0 %v1196_v21  ;;  %746 = vmatmul.bf16.vlgmr.msrb.gmra.mxu1 %v1740_v33  ;;  %v1345_v21 = vld [vmem:[#allocation4 + $0x2a8] sm:$0xf0]  ;;  %v1553_v55 = vld [vmem:[#allocation7 + $0x20] sm:$0xff] }
  0x57   :  { %790 = vmatpush.bf16.msra.mxu1 %v1260_v23  ;;  %759 = vmatmul.bf16.vlgmr.msrb.gmra.mxu2 %v1726_v56  ;;  %v1361_v56 = vld [vmem:[#allocation4 + $0x2c8] sm:$0xf0]  ;;  %v1220_v23 = vor.u32 %v1505_v14, %v1217_v16  ;;  %v1561_v3 = vld [vmem:[#allocation7 + $0x60] sm:$0xff] }
  0x58   :  { %803 = vmatpush.bf16.msra.mxu2 %v1324_v24  ;;  %772 = vmatmul.bf16.vlgmr.msrb.gmra.mxu3 %v1729_v4  ;;  %v1300_v4 = vor.u32 %v1525_v57, %v1297_v58  ;;  %v1364_v1 = vor.u32 %v1541_v59, %v1361_v56  ;;  %v1284_v24 = vor.u32 %v1521_v18, %v1281_v19  ;;  %v1552_v57 = vld [vmem:[#allocation7 + $0x18] sm:$0xff]  ;;  %v1551_v58 = vld [vmem:[#allocation7 + $0x10] sm:$0xff]  ;;  %v1550_v56 = vld [vmem:[#allocation7 + $0x8] sm:$0xff] }
  0x59   :  { %816 = vmatpush.bf16.msra.mxu3 %v1388_v28  ;;  %v1348_v28 = vor.u32 %v1537_v20, %v1345_v21  ;;  %v1558_v19 = vld [vmem:[#allocation7 + $0x48] sm:$0xff] }
  0x5a   :  { %778 = vmatpush.bf16.msra.mxu0 %v1188_v36  ;;  %v1148_v36 = vor.u32 %v1487_v25, %v1145_v26  ;;  %v1557_v26 = vld [vmem:[#allocation7 + $0x40] sm:$0xff] }
  0x5b   :  { %791 = vmatpush.bf16.msra.mxu1 %v1252_v37  ;;  %v1212_v37 = vor.u32 %v1503_v27, %v1209_v30 }
  0x5c   :  { %804 = vmatpush.bf16.msra.mxu2 %v1316_v38  ;;  %v1276_v38 = vor.u32 %v1519_v31, %v1273_v32 }
  0x5d   :  { %817 = vmatpush.bf16.msra.mxu3 %v1380_v42  ;;  %v1340_v42 = vor.u32 %v1535_v34, %v1337_v35 }
  0x5e   :  { %779 = vmatpush.bf16.msra.mxu0 %v1180_v48  ;;  %v1140_v48 = vor.u32 %v1485_v39, %v1137_v40 }
  0x5f   :  { %792 = vmatpush.bf16.msra.mxu1 %v1244_v49  ;;  %v1204_v49 = vor.u32 %v1501_v41, %v1201_v43 }
  0x60   :  { %805 = vmatpush.bf16.msra.mxu2 %v1308_v50  ;;  %v1268_v50 = vor.u32 %v1517_v44, %v1265_v45 }
  0x61   :  { %818 = vmatpush.bf16.msra.mxu3 %v1372_v54  ;;  %v1554_v54 = vld [vmem:[#allocation7 + $0x28] sm:$0xff] }
  0x62   :  { %780 = vmatpush.bf16.msra.mxu0 %v1172_v60 }
  0x63   :  { %793 = vmatpush.bf16.msra.mxu1 %v1236_v61 }
  0x64   :  { %806 = vmatpush.bf16.msra.mxu2 %v1300_v4 }
  0x65   :  { %819 = vmatpush.bf16.msra.mxu3 %v1364_v1  ;;  %v1562_v1 = vld [vmem:[#allocation7 + $0x68] sm:$0xff] }
  0x66   :  { %781 = vmatpush.bf16.msra.mxu0 %v1164_v9 }
  0x67   :  { %794 = vmatpush.bf16.msra.mxu1 %v1228_v10 }
  0x68   :  { %807 = vmatpush.bf16.msra.mxu2 %v1292_v11  ;;  %v1560_v11 = vld [vmem:[#allocation7 + $0x58] sm:$0xff] }
  0x69   :  { %820 = vmatpush.bf16.msra.mxu3 %v1356_v15 }
  0x6a   :  { %782 = vmatpush.bf16.msra.mxu0 %v1156_v22 }
  0x6b   :  { %795 = vmatpush.bf16.msra.mxu1 %v1220_v23 }
  0x6c   :  { %808 = vmatpush.bf16.msra.mxu2 %v1284_v24 }
  0x6d   :  { %821 = vmatpush.bf16.msra.mxu3 %v1348_v28 }
  0x6e   :  { %783 = vmatpush.bf16.msra.mxu0 %v1148_v36 }
  0x6f   :  { %796 = vmatpush.bf16.msra.mxu1 %v1212_v37 }
  0x70   :  { %809 = vmatpush.bf16.msra.mxu2 %v1276_v38 }
  0x71   :  { %822 = vmatpush.bf16.msra.mxu3 %v1340_v42 }
  0x72   :  { %784 = vmatpush.bf16.msra.mxu0 %v1140_v48 }
  0x73   :  { %797 = vmatpush.bf16.msra.mxu1 %v1204_v49 }
  0x74   :  { %810 = vmatpush.bf16.msra.mxu2 %v1268_v50 }
  0x75   :  { %823 = vmatpush.bf16.msra.mxu3 %v1332_v51  ;;  %785 = vmatmul.bf16.vlgmr.msra.gmra.mxu0 %v1731_v5  ;;  %v1549_v5 = vld [vmem:[#allocation7] sm:$0xff]  ;;  %v1573_v51 = vld [vmem:[%s1760_s4] ss:$0 sm:$0xff] }
  0x76   :  { %969 = vmatpush.bf16.msrb.mxu0 %v1556_v52  ;;  %798 = vmatmul.bf16.vlgmr.msra.gmra.mxu1 %v1734_v17  ;;  %v187_v17 = vld [vmem:[#allocation6] sm:$0x3] }
  0x77   :  { %811 = vmatmul.bf16.vlgmr.msra.gmra.mxu2 %v1738_v29  ;;  %v1564_v29 = vld [vmem:[#allocation7 + $0x78] sm:$0xff]  ;;  %v189_v4 = vperm.slane %v187_v17, 0  ;;  %v190_v30 = vperm.slane %v187_v17, 1 }
  0x78   :  { %824 = vmatmul.bf16.vlgmr.msra.gmra.mxu3 %v1740_v33  ;;  %982 = vmatpush.bf16.msrb.mxu1 %v1564_v29  ;;  %v1563_v33 = vld [vmem:[#allocation7 + $0x70] sm:$0xff] }
  0x7a   :  { %970 = vmatpush.bf16.msrb.mxu0 %v1555_v53 }
  0x7c   :  { %983 = vmatpush.bf16.msrb.mxu1 %v1563_v33 }
  0x7e   :  { %971 = vmatpush.bf16.msrb.mxu0 %v1554_v54 }
  0x80   :  { %984 = vmatpush.bf16.msrb.mxu1 %v1562_v1 }
  0x82   :  { %972 = vmatpush.bf16.msrb.mxu0 %v1553_v55 }
  0x84   :  { %985 = vmatpush.bf16.msrb.mxu1 %v1561_v3 }
  0x86   :  { %973 = vmatpush.bf16.msrb.mxu0 %v1552_v57 }
  0x88   :  { %986 = vmatpush.bf16.msrb.mxu1 %v1560_v11 }
  0x8a   :  { %974 = vmatpush.bf16.msrb.mxu0 %v1551_v58 }
  0x8c   :  { %987 = vmatpush.bf16.msrb.mxu1 %v1559_v13 }
  0x8e   :  { %975 = vmatpush.bf16.msrb.mxu0 %v1550_v56 }
  0x90   :  { %988 = vmatpush.bf16.msrb.mxu1 %v1558_v19 }
  0x92   :  { %976 = vmatpush.bf16.msrb.mxu0 %v1549_v5 }
  0x94   :  { %989 = vmatpush.bf16.msrb.mxu1 %v1557_v26 }
  0xb2   :  { %v682_v59 = vpop.f32.mrf.mxu0 }
  0xb3   :  { %v695_v60 = vpop.f32.mrf.mxu1  ;;  %v683_v2 = vadd.f32 %v682_v59, %v189_v4 }
  0xb5   :  { %v696_v6 = vadd.f32 %v695_v60, %v683_v2 }
  0xba   :  { %v684_v61 = vpop.f32.mrf.mxu0  ;;  %v708_v62 = vpop.f32.mrf.mxu2 }
  0xbb   :  { %v697_v63 = vpop.f32.mrf.mxu1  ;;  %v721_v0 = vpop.f32.mrf.mxu3  ;;  %v709_v9 = vadd.f32 %v708_v62, %v696_v6 }
  0xbd   :  { %v722_v10 = vadd.f32 %v721_v0, %v709_v9 }
  0xc2   :  { %v710_v7 = vpop.f32.mrf.mxu2 }
  0xc3   :  { %v723_v8 = vpop.f32.mrf.mxu3 }
  0xd2   :  { %v734_v12 = vpop.f32.mrf.mxu0 }
  0xd3   :  { %v735_v14 = vadd.f32 %v734_v12, %v722_v10  ;;  %v747_v15 = vpop.f32.mrf.mxu1 }
  0xd5   :  { %v748_v16 = vadd.f32 %v747_v15, %v735_v14 }
  0xd7   :  { %vm829_vm0 = vcmp.gt.f32.partialorder %v748_v16, 0.0  ;;  %v831_v18 = vmul.f32 0.2, %v748_v16 }
  0xd9   :  { %v833_v20 = vsel %vm829_vm0, %v748_v16, %v831_v18 }
  0xda   :  { %v760_v21 = vpop.f32.mrf.mxu2  ;;  %v835_v22 = vpack.c.bf16 %v833_v20, %v833_v20  ;;  %v736_v24 = vpop.f32.mrf.mxu0 }
  0xdb   :  { %v773_v23 = vpop.f32.mrf.mxu3  ;;  %v749_v25 = vpop.f32.mrf.mxu1  ;;  %v761_v31 = vadd.f32 %v760_v21, %v190_v30 }
  0xdc   :  { %977 = vmatmul.bf16.vlgmr.msrb.gmra.mxu0 %v835_v22 }
  0xdd   :  { %v774_v32 = vadd.f32 %v773_v23, %v761_v31 }
  0xe2   :  { %v762_v27 = vpop.f32.mrf.mxu2 }
  0xe3   :  { %v775_v28 = vpop.f32.mrf.mxu3 }
  0xf2   :  { %v786_v34 = vpop.f32.mrf.mxu0 }
  0xf3   :  { %v799_v35 = vpop.f32.mrf.mxu1  ;;  %v787_v36 = vadd.f32 %v786_v34, %v774_v32 }
  0xf5   :  { %v800_v37 = vadd.f32 %v799_v35, %v787_v36 }
  0xfa   :  { %v812_v38 = vpop.f32.mrf.mxu2  ;;  %v788_v41 = vpop.f32.mrf.mxu0 }
  0xfb   :  { %v813_v39 = vadd.f32 %v812_v38, %v800_v37  ;;  %v825_v40 = vpop.f32.mrf.mxu3  ;;  %v801_v42 = vpop.f32.mrf.mxu1 }
  0xfd   :  { %v826_v43 = vadd.f32 %v825_v40, %v813_v39 }
  0xff   :  { %vm830_vm1 = vcmp.gt.f32.partialorder %v826_v43, 0.0  ;;  %v832_v44 = vmul.f32 0.2, %v826_v43 }
 0x101   :  { %v834_v45 = vsel %vm830_vm1, %v826_v43, %v832_v44 }
 0x102   :  { %v836_v46 = vpack.c.bf16 %v834_v45, %v834_v45  ;;  %v814_v47 = vpop.f32.mrf.mxu2 }
 0x103   :  { %v827_v48 = vpop.f32.mrf.mxu3 }
 0x104   :  { %990 = vmatmul.bf16.vlgmr.msrb.gmra.mxu1 %v836_v46 }
 0x159   :  { %v978_v49 = vpop.f32.mrf.mxu0 }
 0x15a   :  { %v979_v52 = vadd.f32 %v1573_v51, %v978_v49 }
 0x161   :  { %v980_v50 = vpop.f32.mrf.mxu0 }
 0x181   :  { %v991_v53 = vpop.f32.mrf.mxu1 }
 0x182   :  { %v992_v54 = vadd.f32 %v991_v53, %v979_v52 }
 0x184   :  { %v995_v55 = vmax.f32 %v992_v54, 0.0 }
 0x186   :  { %997 = vst.msk [vmem:[%s1761_s5] sm:$0xff] %vm996_vm2, %v995_v55 }
 0x189   :  { %v993_v57 = vpop.f32.mrf.mxu1 }
 0x18a   :  { %1002 = vsyncpa [#allocation3], 1 }
 0x18b   :  { %1003 = vsyncpa [#allocation5], 1 }
 0x18c   :  { %1004 = vsyncpa [#allocation8], 1 }

</bundles_post_ra>
